<compile_context>
chip_gen: v7x
topology: tpu7x:2x2x1
jax: 0.10.0
libtpu: 0.0.40
codegen_flags: <defaults>
</compile_context>

<pallas_src>
import math

import jax
import jax.numpy as jnp
from jax.experimental import pallas as pl
from jax.experimental.pallas import tpu as pltpu

_MIN_TILE_BYTES = 256 * 1024  # reject copy-free tilings whose tiles are this tiny
_TINY_ROWS = 64               # below this, a single grid step (splitting not worth it)


def _max_tile_bytes() -> int:
    """Per-buffer output-tile budget, generation aware (bigger on v6e/v7x,
    conservative on v5e/older so 2x tile + index scratch fits scoped VMEM)."""
    try:
        kind = jax.devices()[0].device_kind.lower()
    except Exception:
        return 4 << 20
    if any(tag in kind for tag in ("v6", "v7", "7x")):
        return 8 << 20
    return 4 << 20


def _largest_mult8_divisor(n: int, cap: int) -> int:
    """Largest d with d % 8 == 0, d | n, d <= cap (0 if none)."""
    best = 0
    d = 8
    while d <= cap:
        if n % d == 0:
            best = d
        d += 8
    return best


def _split_steps(n_steps: int):
    """Factor the step count into (parallel outer, arbitrary inner) grid axes."""
    if n_steps <= 1:
        return 1, 1
    if n_steps % 2 == 0:
        return 2, n_steps // 2  # perfect 2-TensorCore balance, deep inner pipeline
    return n_steps, 1           # odd: favour core balance; index hoist degrades only


def _choose_tiling(total: int, max_tile_bytes: int):
    """Pick (lane, tile_rows, grid_outer, grid_inner) for `total` f32 elements."""
    # Preferred: copy-free tiling at the widest lane that divides `total` exactly.
    for lane in (1024, 512, 256, 128):
        if total % lane:
            continue
        rows = total // lane
        cap = max(8, (max_tile_bytes // (4 * lane)) // 8 * 8)
        if rows <= _TINY_ROWS and rows <= cap:
            return lane, rows, 1, 1            # single full-dim block (always legal)
        for min_steps in (4, 2, 1):            # prefer >=4 steps (megacore + pipeline)
            tr = _largest_mult8_divisor(rows, min(cap, rows // min_steps))
            if tr and tr * lane * 4 >= _MIN_TILE_BYTES:
                outer, inner = _split_steps(rows // tr)
                return lane, tr, outer, inner
        if rows <= cap:
            return lane, rows, 1, 1            # full-dim single block, still no padding
        # would need padding at this lane width; try a narrower lane first
    # Ragged fallback (or no acceptable exact tiling): pad rows, slice afterwards.
    lane = 1024
    rows = pl.cdiv(total, lane)
    cap = max(8, (max_tile_bytes // (4 * lane)) // 8 * 8)
    if rows <= _TINY_ROWS:
        return lane, rows, 1, 1
    target = max(8, ((rows + 3) // 4 + 7) // 8 * 8)  # aim for ~4 steps, multiple of 8
    tile_rows = min(cap, target)
    outer, inner = _split_steps(pl.cdiv(rows, tile_rows))
    return lane, tile_rows, outer, inner


def _rand_uniform_kernel(seedmix_ref, o_ref, idx_ref):
    """Fill o_ref with uniform [0,1) float32 via a counter-based lowbias32 hash."""
    tile_rows, lane = o_ref.shape

    # Local flat index (row*lane + col) is tile-invariant: (re)compute it only at
    # inner-step 0.  With the ("parallel","arbitrary") grid this fires on every
    # core's first visit of each outer chunk, so every TensorCore initialises its
    # own scratch before reading it.
    @pl.when(pl.program_id(1) == 0)
    def _():
        rows = jax.lax.broadcasted_iota(jnp.int32, (tile_rows, lane), 0)
        cols = jax.lax.broadcasted_iota(jnp.int32, (tile_rows, lane), 1)
        idx_ref[...] = rows * jnp.int32(lane) + cols

    # Global flat element index = local index + per-step base (scalar-unit work).
    step = pl.program_id(0) * pl.num_programs(1) + pl.program_id(1)
    base = step * jnp.int32(tile_rows * lane)
    idx = (idx_ref[...] + base).astype(jnp.uint32)

    # lowbias32 finalizer: XOR / logical-shift / 32-bit multiply only (VPU-friendly,
    # lowers in interpret mode too).  Seed mixing is pre-folded in the wrapper.
    x = idx ^ seedmix_ref[0].astype(jnp.uint32)
    x = x ^ (x >> 16)
    x = x * jnp.uint32(0x7FEB352D)
    x = x ^ (x >> 15)
    x = x * jnp.uint32(0x846CA68B)
    x = x ^ (x >> 16)

    # Top 24 bits -> exactly representable float32, uniform in [0, 1).
    o_ref[...] = (x >> 8).astype(jnp.int32).astype(jnp.float32) * jnp.float32(
        1.0 / (1 << 24)
    )


def _reference_uniform(shape, seed: int):
    """Pure-jnp (non-Pallas) reference of the same counter hash, for testing."""
    total = int(math.prod(shape))
    idx = jnp.arange(total, dtype=jnp.uint32)
    x = idx ^ jnp.uint32((int(seed) * 0x9E3779B9) & 0xFFFFFFFF)
    x = x ^ (x >> 16)
    x = x * jnp.uint32(0x7FEB352D)
    x = x ^ (x >> 15)
    x = x * jnp.uint32(0x846CA68B)
    x = x ^ (x >> 16)
    out = (x >> 8).astype(jnp.int32).astype(jnp.float32) * jnp.float32(1.0 / (1 << 24))
    return out.reshape(shape)


def random_model_forward(x, seed: int = 0):
    """Pallas equivalent of RandomModel.forward: uniform [0,1) randoms, x's shape."""
    shape = tuple(x.shape)
    total = int(math.prod(shape))
    if total == 0:
        return jnp.zeros(shape, jnp.float32)
    # TODO(synk): the 32-bit counter repeats for tensors with > 2^32 elements.

    lane, tile_rows, grid_outer, grid_inner = _choose_tiling(total, _max_tile_bytes())
    rows_total = grid_outer * grid_inner * tile_rows
    tile_bytes = tile_rows * lane * 4
    vmem_limit = max(3 * tile_bytes + (8 << 20), 16 << 20)

    # Pre-fold the seed mix (seed * golden-ratio constant) on the host; pass as int32.
    seedmix = (int(seed) * 0x9E3779B9) & 0xFFFFFFFF
    if seedmix >= 1 << 31:
        seedmix -= 1 << 32
    seed_arr = jnp.array([seedmix], dtype=jnp.int32)

    inner = grid_inner  # captured by the index map

    out2d = pl.pallas_call(
        _rand_uniform_kernel,
        out_shape=jax.ShapeDtypeStruct((rows_total, lane), jnp.float32),
        grid=(grid_outer, grid_inner),
        in_specs=[pl.BlockSpec(memory_space=pltpu.MemorySpace.SMEM)],
        out_specs=pl.BlockSpec((tile_rows, lane), lambda o, i: (o * inner + i, 0)),
        scratch_shapes=[pltpu.VMEM((tile_rows, lane), jnp.int32)],
        compiler_params=pltpu.CompilerParams(
            dimension_semantics=("parallel", "arbitrary"),
            vmem_limit_bytes=vmem_limit,
        ),
        cost_estimate=pl.CostEstimate(
            flops=20 * total, transcendentals=0, bytes_accessed=4 * total
        ),
    )(seed_arr)

    flat = out2d.reshape(-1)
    if rows_total * lane != total:  # ragged fallback only; exact tilings skip this
        flat = flat[:total]
    return flat.reshape(shape)


if __name__ == "__main__":
    key = jax.random.PRNGKey(0)
    # Small NCHW input, matching the conv-style layout the module would receive.
    x = jax.random.normal(key, (2, 4, 16, 16), dtype=jnp.float32)

    y = jax.block_until_ready(random_model_forward(x, seed=1234))
    assert y.shape == x.shape, (y.shape, x.shape)
    assert y.dtype == jnp.float32
    assert bool(jnp.all(y >= 0.0)) and bool(jnp.all(y < 1.0))
    assert bool(jnp.array_equal(y, _reference_uniform(x.shape, 1234)))

    # Different seeds must give different draws.
    y2 = jax.block_until_ready(random_model_forward(x, seed=4321))
    assert not bool(jnp.all(y == y2))

    # Multi-step path: exercises the 2-D grid, megacore split and hoisted index scratch.
    xb = jnp.zeros((4, 32, 128, 128), dtype=jnp.float32)
    yb = jax.block_until_ready(random_model_forward(xb, seed=7))
    assert yb.shape == xb.shape
    assert bool(jnp.all(yb >= 0.0)) and bool(jnp.all(yb < 1.0))
    assert bool(jnp.array_equal(yb, _reference_uniform(xb.shape, 7)))

    # Ragged path: exercises the pad-and-slice fallback.
    xr = jnp.zeros((3, 5, 7), dtype=jnp.float32)
    yr = jax.block_until_ready(random_model_forward(xr, seed=3))
    assert yr.shape == xr.shape
    assert bool(jnp.array_equal(yr, _reference_uniform(xr.shape, 3)))

    print("KERNEL_OK")
</pallas_src>

<mosaic_0001>
module attributes {stable_mosaic.version = 11 : i64} {
  func.func @_rand_uniform_kernel(%arg0: i32, %arg1: i32, %arg2: memref<1xi32, #tpu.memory_space<smem>>, %arg3: memref<2x1024xf32, #tpu.memory_space<vmem>>, %arg4: memref<2x1024xi32, #tpu.memory_space<vmem>>) attributes {dimension_semantics = [#tpu.dimension_semantics<parallel>, #tpu.dimension_semantics<arbitrary>], iteration_bounds = array<i64: 1, 1>, scalar_prefetch = 0 : i64, scratch_operands = 1 : i64, tpu.core_type = #tpu.core_type<tc>, window_params = [{transform_indices = @transform_0, window_bounds = array<i64: 1>}, {transform_indices = @transform_1, window_bounds = array<i64: 2, 1024>}]} {
    %c0_i32 = arith.constant 0 : i32
    %0 = arith.cmpi eq, %arg1, %c0_i32 : i32
    %1 = arith.extui %0 : i1 to i32
    %c0_i32_0 = arith.constant 0 : i32
    %2 = arith.cmpi ne, %1, %c0_i32_0 : i32
    scf.if %2 {
      %31 = tpu.iota {dimensions = array<i32: 0>} : vector<2x1024xi32>
      %32 = tpu.iota {dimensions = array<i32: 1>} : vector<2x1024xi32>
      %c1024_i32 = arith.constant 1024 : i32
      %33 = vector.broadcast %c1024_i32 : i32 to vector<2x1024xi32>
      %34 = arith.muli %31, %33 : vector<2x1024xi32>
      %35 = arith.addi %34, %32 : vector<2x1024xi32>
      %c0_6 = arith.constant 0 : index
      %c0_7 = arith.constant 0 : index
      %36 = vector.load %arg4[%c0_6, %c0_7] : memref<2x1024xi32, #tpu.memory_space<vmem>>, vector<2x1024xi32>
      tpu.vector_store %arg4[%c0_6, %c0_7], %35 {strides = array<i32>} : memref<2x1024xi32, #tpu.memory_space<vmem>>, vector<2x1024xi32>,
    } else {
    }
    %c1_i32 = arith.constant 1 : i32
    %3 = arith.muli %arg0, %c1_i32 : i32
    %4 = arith.addi %3, %arg1 : i32
    %c2048_i32 = arith.constant 2048 : i32
    %5 = arith.muli %4, %c2048_i32 : i32
    %c0 = arith.constant 0 : index
    %c0_1 = arith.constant 0 : index
    %6 = vector.load %arg4[%c0, %c0_1] : memref<2x1024xi32, #tpu.memory_space<vmem>>, vector<2x1024xi32>
    %7 = vector.broadcast %5 : i32 to vector<2x1024xi32>
    %8 = arith.addi %6, %7 : vector<2x1024xi32>
    %c0_2 = arith.constant 0 : index
    %9 = memref.load %arg2[%c0_2] : memref<1xi32, #tpu.memory_space<smem>>
    %10 = vector.broadcast %9 : i32 to vector<2x1024xi32>
    %11 = arith.xori %8, %10 : vector<2x1024xi32>
    %c16_i32 = arith.constant 16 : i32
    %12 = vector.broadcast %c16_i32 : i32 to vector<2x1024xi32>
    %13 = arith.shrui %11, %12 : vector<2x1024xi32>
    %14 = arith.xori %11, %13 : vector<2x1024xi32>
    %c2146121005_i32 = arith.constant 2146121005 : i32
    %15 = vector.broadcast %c2146121005_i32 : i32 to vector<2x1024xi32>
    %16 = arith.muli %14, %15 : vector<2x1024xi32>
    %c15_i32 = arith.constant 15 : i32
    %17 = vector.broadcast %c15_i32 : i32 to vector<2x1024xi32>
    %18 = arith.shrui %16, %17 : vector<2x1024xi32>
    %19 = arith.xori %16, %18 : vector<2x1024xi32>
    %c-2073254261_i32 = arith.constant -2073254261 : i32
    %20 = vector.broadcast %c-2073254261_i32 : i32 to vector<2x1024xi32>
    %21 = arith.muli %19, %20 : vector<2x1024xi32>
    %c16_i32_3 = arith.constant 16 : i32
    %22 = vector.broadcast %c16_i32_3 : i32 to vector<2x1024xi32>
    %23 = arith.shrui %21, %22 : vector<2x1024xi32>
    %24 = arith.xori %21, %23 : vector<2x1024xi32>
    %c8_i32 = arith.constant 8 : i32
    %25 = vector.broadcast %c8_i32 : i32 to vector<2x1024xi32>
    %26 = arith.shrui %24, %25 : vector<2x1024xi32>
    %27 = arith.sitofp %26 : vector<2x1024xi32> to vector<2x1024xf32>
    %cst = arith.constant 5.96046448E-8 : f32
    %28 = vector.broadcast %cst : f32 to vector<2x1024xf32>
    %29 = arith.mulf %27, %28 : vector<2x1024xf32>
    %c0_4 = arith.constant 0 : index
    %c0_5 = arith.constant 0 : index
    %30 = vector.load %arg3[%c0_4, %c0_5] : memref<2x1024xf32, #tpu.memory_space<vmem>>, vector<2x1024xf32>
    tpu.vector_store %arg3[%c0_4, %c0_5], %29 {strides = array<i32>} : memref<2x1024xf32, #tpu.memory_space<vmem>>, vector<2x1024xf32>,
    return
  }
  func.func @transform_0(%arg0: i32, %arg1: i32) -> i32 {
    %c0_i32 = arith.constant 0 : i32
    %c0_i32_0 = arith.constant 0 : i32
    return %c0_i32 : i32
  }
  func.func @transform_1(%arg0: i32, %arg1: i32) -> (i32, i32) {
    %c1_i32 = arith.constant 1 : i32
    %0 = arith.muli %arg0, %c1_i32 : i32
    %1 = arith.addi %0, %arg1 : i32
    %c0_i32 = arith.constant 0 : i32
    %c0_i32_0 = arith.constant 0 : i32
    return %1, %c0_i32 : i32, i32
  }
}

</mosaic_0001>

<bundles_post_ra>
// kernel: tpu_custom_call.1
= control target key start
LH: loop header
LB: loop body
LE: loop exit
PB: predicated region body
PF: predicated region fallthrough
CT: control target
= control target key end

     0   :  { %v15_v0 = vlaneseq  ;;  %s177_s0 = inlined_call_operand.<no memory space> [shape: s32[1], index: 0, kind: input, shape index: {}]   ;;  %s178_s1 = inlined_call_operand.hbm [shape: f32[2,1024], index: 1, kind: output, shape index: {}]  }
   0x1   :  { %7 = vsyncpa [#allocation5], 0  ;;  %v150_v1 = vmov 1983009808   ;;  %v79_v28 = vstv %s177_s0  ;;  %s151_s0 = smov [#allocation4]  }
   0x2   :  { %v38_v2 = vunpack.c.l.s4 %v150_v1  ;;  %v16_v3 = vshrl.u32 %v15_v0, 7  ;;  %v18_v4 = vand.u32 127, %v15_v0  ;;  %s116_s8 = sshll.u32 %s151_s0, 4  ;;  %s117_s8 = int_to_ptr.vmem [resolvable:$true] %s116_s8 }
   0x3   :  { %s126_s9 = scalar_lea.vmem %s117_s8, 256  ;;  %p131_p1 = scmp.lt.s32.totalorder %s117_s8, %s117_s8 }
   0x4   :  { %v39_v5 = vunpack.c.0.s8 %v38_v2  ;;  %v19_v6 = vadd.s32 128, %v18_v4  ;;  %v20_v7 = vadd.s32 256, %v18_v4  ;;  %v21_v8 = vadd.s32 384, %v18_v4  ;;  %p127_p0 = scmp.ne.s32.totalorder %s117_s8, %s126_s9  ;;  %p132_p2 = scmp.lt.s32.totalorder %s126_s9, %s126_s9 }
   0x5   :  { %v26_v9 = vmul.u32 1024, %v16_v3  ;;  %v22_v11 = vadd.s32 512, %v18_v4  ;;  %v23_v12 = vadd.s32 640, %v18_v4  ;;  %v24_v13 = vadd.s32 768, %v18_v4 }
   0x6   :  { %v42_v10 = vsub.s32 %v39_v5, %v16_v3  ;;  %v25_v18 = vadd.s32 896, %v18_v4  ;;  %p133_p3 = por %p132_p2, %p131_p1 }
   0x7   :  { %v27_v14 = vadd.s32 %v26_v9, %v18_v4  ;;  %v28_v15 = vadd.s32 %v26_v9, %v19_v6  ;;  %v29_v16 = vadd.s32 %v26_v9, %v20_v7  ;;  %v30_v17 = vadd.s32 %v26_v9, %v21_v8 }
   0x8   :  { %v31_v19 = vadd.s32 %v26_v9, %v22_v11  ;;  %v32_v20 = vadd.s32 %v26_v9, %v23_v12  ;;  %v33_v21 = vadd.s32 %v26_v9, %v24_v13  ;;  %v34_v24 = vadd.s32 %v26_v9, %v25_v18  ;;  %p134_p4 = pnand %p133_p3, %p127_p0 }
   0x9   :  { %v35_v22 = vcombine.low %v27_v14, %v28_v15  ;;  %v36_v23 = vcombine.low %v29_v16, %v30_v17 }
   0xa   :  { %v52_v25 = vcombine.low %v31_v19, %v32_v20  ;;  %v53_v29 = vcombine.low %v33_v21, %v34_v24 }
   0xb   :  { %v43_v26 = vrot.slane %v35_v22, %v42_v10  ;;  %v50_v27 = vrot.slane %v36_v23, %v42_v10 }
   0xc   :  { %v60_v30 = vrot.slane %v52_v25, %v42_v10  ;;  %v67_v32 = vrot.slane %v53_v29, %v42_v10 }
   0xd   :  { %v51_v31 = vcombine.low %v43_v26, %v50_v27 }
   0xe   :  { %v68_v34 = vcombine.low %v60_v30, %v67_v32 }
   0xf   :  { %v80_v33 = vxor.u32 %v79_v28, %v51_v31 }
  0x10   :  { %v81_v36 = vxor.u32 %v79_v28, %v68_v34 }
  0x11   :  { %v82_v35 = vshrl.u32 %v80_v33, 16 }
  0x12   :  { %v83_v38 = vshrl.u32 %v81_v36, 16 }
  0x13   :  { %v84_v37 = vxor.u32 %v82_v35, %v80_v33 }
  0x14   :  { %v85_v40 = vxor.u32 %v83_v38, %v81_v36 }
  0x15   :  { %v86_v39 = vmul.u32 2146121005, %v84_v37 }
  0x16   :  { %v87_v42 = vmul.u32 2146121005, %v85_v40 }
  0x17   :  { %v88_v41 = vshrl.u32 %v86_v39, 15 }
  0x18   :  { %v89_v44 = vshrl.u32 %v87_v42, 15 }
  0x19   :  { %v90_v43 = vxor.u32 %v88_v41, %v86_v39 }
  0x1a   :  { %v91_v46 = vxor.u32 %v89_v44, %v87_v42 }
  0x1b   :  { %v92_v45 = vmul.u32 2221713035, %v90_v43 }
  0x1c   :  { %v93_v48 = vmul.u32 2221713035, %v91_v46 }
  0x1d   :  { %v94_v47 = vshrl.u32 %v92_v45, 16 }
  0x1e   :  { %v95_v50 = vshrl.u32 %v93_v48, 16 }
  0x1f   :  { %v96_v49 = vxor.u32 %v94_v47, %v92_v45 }
  0x20   :  { %v97_v52 = vxor.u32 %v95_v50, %v93_v48 }
  0x21   :  { %v98_v51 = vshrl.u32 %v96_v49, 8 }
  0x22   :  { %v99_v54 = vshrl.u32 %v97_v52, 8 }
  0x23   :  { %v100_v53 = vcvt.s32.f32 %v98_v51 }
  0x24   :  { %v101_v56 = vcvt.s32.f32 %v99_v54 }
  0x25   :  { %v102_v55 = vmul.f32 5.9604645e-08, %v100_v53 }
  0x26   :  { %v103_v57 = vmul.f32 5.9604645e-08, %v101_v56 }
  0x27   :  { %104 = vst [vmem:[#allocation4] sm:$0xff] %v102_v55 }
  0x28   :  { %105 = vst [vmem:[#allocation4 + $0x8] sm:$0xff] %v103_v57 }
  0x29   :  { %137 = shalt.err (!%p134_p4)
}
  0x2a   :  { %s138_s12 = scalar_lea.hbm %s178_s1, 256 }
  0x2b   :  { %p139_p5 = scmp.ne.s32.totalorder %s178_s1, %s138_s12  ;;  %p142_p6 = scmp.lt.u32.totalorder %s138_s12, %s178_s1 }
  0x2d   :  { %p144_p7 = pnand %p142_p6, %p139_p5 }
  0x2f   :  { %147 = shalt.err (!%p144_p7)
}
  0x30   :  { %119 = dma.vmem_to_hbm [thread:$0]  %s117_s8, 256, %s178_s1, [#allocation5]  }
  0x31   :  { %148 = dma.done.wait [#allocation5], 256  }
  0x32   :  { %149 = vsyncadd [#allocation5], 4294967040 }
  0x33   :  { %123 = vsyncpa [#allocation5], 1 }

</bundles_post_ra>
